<compile_context>
chip_gen: v7x
topology: tpu7x:2x2x1
jax: 0.10.0
libtpu: 0.0.40
codegen_flags: <defaults>
</compile_context>

<pallas_src>
import jax
import jax.numpy as jnp
from jax import lax
from jax.experimental import pallas as pl
from jax.experimental.pallas import tpu as pltpu

IN_FEATS = 4
HIDDEN = 64            # conv1: heads=2 * (HIDDEN//2)=32 -> concat -> 64
EMBED = 64             # conv2: heads=1, concat=False -> 64
HEADS1 = 2
C1 = HIDDEN // HEADS1  # 32
NEG_SLOPE = 0.2        # GATConv default negative_slope
MASK_NEG = -1e30

# Packed-parameter slab layout (f32, lane-dense):
#   pw [PW_ROWS, 64]:
#     rows 0:64  -> conv2 lin weight W2 [64, 64]
#     rows 64:68 -> conv1 lin weight W1 [4, 64]
#     row  68    -> conv1 bias b1 [64]
#     row  69    -> conv2 bias b2 [64]
#   pa [64, 8]:
#     col 0 = conv1 att_src head0 (rows 0:32), col 1 = att_src head1 (rows 32:64)
#     col 2 = conv1 att_dst head0 (rows 0:32), col 3 = att_dst head1 (rows 32:64)
#     col 4 = conv2 att_src, col 5 = conv2 att_dst
ROW_W2 = 0
ROW_W1 = HIDDEN
ROW_B1 = HIDDEN + IN_FEATS
ROW_B2 = ROW_B1 + 1
PW_ROWS = 72
PA_COLS = 8


def _leaky_relu(x, slope):
    return jnp.where(x > 0, x, slope * x)


def _elu(x):
    return jnp.where(x > 0, x, jnp.exp(x) - 1.0)


def pathway_encoder_kernel(x_ref, adj_ref, pw_ref, pa_ref, out_ref):
    x = x_ref[...]            # [N, IN_FEATS]
    adj = adj_ref[...]        # [N, N] row = dst, col = src (self loops included)

    # Hoisted masked-softmax additive bias, reused by all three attention heads.
    abias = jnp.where(adj > 0, 0.0, MASK_NEG)                  # [N, N]

    w1 = pw_ref[ROW_W1:ROW_W1 + IN_FEATS, :]                   # [4, 64]
    b1 = pw_ref[ROW_B1:ROW_B1 + 1, :]                          # [1, 64]
    b2 = pw_ref[ROW_B2:ROW_B2 + 1, :]                          # [1, 64]
    a1 = pa_ref[:, 0:4]                                        # [64, 4]
    a2 = pa_ref[:, 4:6]                                        # [64, 2]

    def attend(dst_col, src_row, h_head):
        # dst_col: [N,1], src_row: [1,N], h_head: [N,C]
        logits = _leaky_relu(dst_col + src_row, NEG_SLOPE) + abias
        m = jnp.max(logits, axis=-1, keepdims=True)
        p = jnp.exp(logits - m)                                # masked entries underflow to 0
        denom = jnp.maximum(jnp.sum(p, axis=-1, keepdims=True), 1e-30)
        attn = p * pl.reciprocal(denom, approx=True)           # EUP slot (free-ish)
        return jnp.dot(attn, h_head, preferred_element_type=jnp.float32)

    # ---- GATConv 1: lin(4 -> 2*32), 2 heads, concat=True ----
    h = jnp.dot(x, w1, preferred_element_type=jnp.float32)     # [N, 64]
    # One packed matmul gives all four (src/dst x head) attention projections.
    pr1 = jnp.dot(h, a1, preferred_element_type=jnp.float32)   # [N, 4]
    src1 = pr1[:, 0:2].T                                       # [2, N] single small transpose
    g0 = attend(pr1[:, 2:3], src1[0:1, :], h[:, :C1])          # [N, 32]
    g1 = attend(pr1[:, 3:4], src1[1:2, :], h[:, C1:])          # [N, 32]

    # concat(heads) + bias, ELU.  Concat is realized by splitting the next matmul.
    z0 = _elu(g0 + b1[:, :C1])
    z1 = _elu(g1 + b1[:, C1:])
    # Dropout(p=0.2): identity in eval/inference mode.
    # TODO(synk): training-mode stochastic dropout not implemented (inference semantics).

    # ---- GATConv 2: lin(64 -> 64), 1 head, concat=False (mean over 1 head = id) ----
    h2 = (jnp.dot(z0, pw_ref[ROW_W2:ROW_W2 + C1, :], preferred_element_type=jnp.float32)
          + jnp.dot(z1, pw_ref[C1:HIDDEN, :], preferred_element_type=jnp.float32))   # [N, 64]
    pr2 = jnp.dot(h2, a2, preferred_element_type=jnp.float32)  # [N, 2]
    o2 = attend(pr2[:, 1:2], pr2[:, 0:1].T, h2) + b2           # [N, 64]

    # ---- global_mean_pool: batch id constant per graph -> mean over nodes ----
    n = o2.shape[0]
    out_ref[...] = (jnp.sum(o2, axis=0, keepdims=True) * (1.0 / n)).astype(out_ref.dtype)


def pack_params(params):
    f32 = jnp.float32
    pw = jnp.zeros((PW_ROWS, HIDDEN), f32)
    pw = pw.at[ROW_W2:ROW_W2 + HIDDEN, :].set(params["w2"])
    pw = pw.at[ROW_W1:ROW_W1 + IN_FEATS, :].set(params["w1"])
    pw = pw.at[ROW_B1, :].set(params["b1"][0])
    pw = pw.at[ROW_B2, :].set(params["b2"][0])

    pa = jnp.zeros((HIDDEN, PA_COLS), f32)
    pa = pa.at[:C1, 0].set(params["as1"][:, 0])
    pa = pa.at[C1:, 1].set(params["as1"][:, 1])
    pa = pa.at[:C1, 2].set(params["ad1"][:, 0])
    pa = pa.at[C1:, 3].set(params["ad1"][:, 1])
    pa = pa.at[:, 4].set(params["as2"][:, 0])
    pa = pa.at[:, 5].set(params["ad2"][:, 0])
    return pw, pa


@jax.jit
def pathway_encoder(x, adj, params):
    """x: [B, N, IN_FEATS], adj: [B, N, N] dense masks (row=dst, col=src, self loops)."""
    B, N, _ = x.shape
    pw, pa = pack_params(params)
    out = pl.pallas_call(
        pathway_encoder_kernel,
        out_shape=jax.ShapeDtypeStruct((B, 1, EMBED), jnp.float32),
        grid=(B,),
        in_specs=[
            pl.BlockSpec((None, N, IN_FEATS), lambda b: (b, 0, 0)),
            pl.BlockSpec((None, N, N), lambda b: (b, 0, 0)),
            # Constant block index -> parameter slabs stay resident across grid steps.
            pl.BlockSpec((PW_ROWS, HIDDEN), lambda b: (0, 0)),
            pl.BlockSpec((HIDDEN, PA_COLS), lambda b: (0, 0)),
        ],
        out_specs=pl.BlockSpec((None, 1, EMBED), lambda b: (b, 0, 0)),
        compiler_params=pltpu.CompilerParams(
            dimension_semantics=("parallel",)),   # v7x: 2 TensorCores split the graphs
    )(x, adj, pw, pa)
    return out.reshape(B, EMBED)


def reference_forward(x, adj, params):
    """Pure-JAX dense reference of the same forward pass (single graph)."""
    P = lax.Precision.HIGHEST

    def gat_head(hh, a_s, a_d):
        a_src = jnp.dot(hh, a_s, precision=P)
        a_dst = jnp.dot(hh, a_d, precision=P)
        logits = _leaky_relu(a_dst + a_src.T, NEG_SLOPE)
        logits = jnp.where(adj > 0, logits, MASK_NEG)
        attn = jax.nn.softmax(logits, axis=-1)
        attn = jnp.where(adj > 0, attn, 0.0)
        return jnp.dot(attn, hh, precision=P)

    h = jnp.dot(x, params["w1"], precision=P)
    outs = [gat_head(h[:, i * C1:(i + 1) * C1],
                     params["as1"][:, i:i + 1], params["ad1"][:, i:i + 1])
            for i in range(HEADS1)]
    h1 = _elu(jnp.concatenate(outs, axis=-1) + params["b1"])
    h2 = jnp.dot(h1, params["w2"], precision=P)
    o2 = gat_head(h2, params["as2"], params["ad2"]) + params["b2"]
    return jnp.mean(o2, axis=0, keepdims=True)


def make_params(key):
    ks = jax.random.split(key, 8)
    f32 = jnp.float32
    return {
        # conv1: Linear(4 -> heads*32, bias=False), att_src/att_dst per head, bias[64]
        "w1": jax.random.normal(ks[0], (IN_FEATS, HEADS1 * C1), f32) * 0.3,
        "as1": jax.random.normal(ks[1], (C1, HEADS1), f32) * 0.3,
        "ad1": jax.random.normal(ks[2], (C1, HEADS1), f32) * 0.3,
        "b1": jax.random.normal(ks[3], (1, HEADS1 * C1), f32) * 0.1,
        # conv2: Linear(64 -> 64, bias=False), att_src/att_dst (1 head), bias[64]
        "w2": jax.random.normal(ks[4], (HIDDEN, EMBED), f32) * 0.15,
        "as2": jax.random.normal(ks[5], (EMBED, 1), f32) * 0.15,
        "ad2": jax.random.normal(ks[6], (EMBED, 1), f32) * 0.15,
        "b2": jax.random.normal(ks[7], (1, EMBED), f32) * 0.1,
        # NOTE: self.edge_transform = nn.Linear(2, hidden_dim) exists in __init__
        # but is never used in forward(), so it is intentionally omitted.
    }


def make_graph(key, n_nodes):
    kx, ke = jax.random.split(key)
    x = jax.random.normal(kx, (n_nodes, IN_FEATS), jnp.float32)
    # Dense adjacency mask: row = destination, col = source; self loops added
    # (matches GATConv add_self_loops=True and guarantees a nonzero softmax denom).
    adj = jax.random.bernoulli(ke, 0.3, (n_nodes, n_nodes)).astype(jnp.float32)
    adj = adj.at[jnp.arange(n_nodes), jnp.arange(n_nodes)].set(1.0)
    return x, adj


if __name__ == "__main__":
    key = jax.random.PRNGKey(0)
    k_g, k_p = jax.random.split(key)

    B, N = 8, 16   # B small pathway graphs per call (grid axis), 16 nodes each
    gkeys = jax.random.split(k_g, B)
    graphs = [make_graph(k, N) for k in gkeys]
    x = jnp.stack([g[0] for g in graphs])      # [B, N, 4]
    adj = jnp.stack([g[1] for g in graphs])    # [B, N, N]
    params = make_params(k_p)

    out = jax.block_until_ready(pathway_encoder(x, adj, params))

    ref = jax.vmap(reference_forward, in_axes=(0, 0, None))(x, adj, params)
    ref = jax.block_until_ready(ref.reshape(B, EMBED))

    assert out.shape == (B, EMBED)
    max_err = jnp.max(jnp.abs(out - ref))
    # kernel uses default MXU precision + approx reciprocal; reference is HIGHEST
    assert jnp.allclose(out, ref, atol=5e-3, rtol=5e-3), f"max abs err {max_err}"
    print("KERNEL_OK")
</pallas_src>

<mosaic_0001>
module attributes {stable_mosaic.version = 11 : i64} {
  func.func @pathway_encoder_kernel(%arg0: i32, %arg1: memref<1x16x4xf32, #tpu.memory_space<vmem>>, %arg2: memref<1x16x16xf32, #tpu.memory_space<vmem>>, %arg3: memref<72x64xf32, #tpu.memory_space<vmem>>, %arg4: memref<64x8xf32, #tpu.memory_space<vmem>>, %arg5: memref<1x1x64xf32, #tpu.memory_space<vmem>>) attributes {dimension_semantics = [#tpu.dimension_semantics<parallel>], iteration_bounds = array<i64: 8>, scalar_prefetch = 0 : i64, scratch_operands = 0 : i64, tpu.core_type = #tpu.core_type<tc>, window_params = [{transform_indices = @transform_0, window_bounds = array<i64: 1, 16, 4>}, {transform_indices = @transform_1, window_bounds = array<i64: 1, 16, 16>}, {pipeline_mode = #tpu.pipeline_mode<synchronous>, transform_indices = @transform_2, window_bounds = array<i64: 72, 64>}, {pipeline_mode = #tpu.pipeline_mode<synchronous>, transform_indices = @transform_3, window_bounds = array<i64: 64, 8>}, {transform_indices = @transform_4, window_bounds = array<i64: 1, 1, 64>}]} {
    %c0 = arith.constant 0 : index
    %c0_0 = arith.constant 0 : index
    %c0_1 = arith.constant 0 : index
    %0 = vector.load %arg1[%c0, %c0_0, %c0_1] : memref<1x16x4xf32, #tpu.memory_space<vmem>>, vector<1x16x4xf32>
    %1 = vector.shape_cast %0 : vector<1x16x4xf32> to vector<16x4xf32>
    %c0_2 = arith.constant 0 : index
    %c0_3 = arith.constant 0 : index
    %c0_4 = arith.constant 0 : index
    %2 = vector.load %arg2[%c0_2, %c0_3, %c0_4] : memref<1x16x16xf32, #tpu.memory_space<vmem>>, vector<1x16x16xf32>
    %3 = vector.shape_cast %2 : vector<1x16x16xf32> to vector<16x16xf32>
    %cst = arith.constant 0.000000e+00 : f32
    %4 = vector.broadcast %cst : f32 to vector<16x16xf32>
    %5 = arith.cmpf ogt, %3, %4 : vector<16x16xf32>
    %cst_5 = arith.constant 0.000000e+00 : f32
    %cst_6 = arith.constant -1.000000e+30 : f32
    %6 = vector.broadcast %cst_5 : f32 to vector<16x16xf32>
    %7 = vector.broadcast %cst_6 : f32 to vector<16x16xf32>
    %8 = arith.select %5, %6, %7 : vector<16x16xi1>, vector<16x16xf32>
    %c64 = arith.constant 64 : index
    %c0_7 = arith.constant 0 : index
    %9 = vector.load %arg3[%c64, %c0_7] : memref<72x64xf32, #tpu.memory_space<vmem>>, vector<4x64xf32>
    %c68 = arith.constant 68 : index
    %c0_8 = arith.constant 0 : index
    %10 = vector.load %arg3[%c68, %c0_8] : memref<72x64xf32, #tpu.memory_space<vmem>>, vector<1x64xf32>
    %c69 = arith.constant 69 : index
    %c0_9 = arith.constant 0 : index
    %11 = vector.load %arg3[%c69, %c0_9] : memref<72x64xf32, #tpu.memory_space<vmem>>, vector<1x64xf32>
    %c0_10 = arith.constant 0 : index
    %c0_11 = arith.constant 0 : index
    %12 = vector.load %arg4[%c0_10, %c0_11] : memref<64x8xf32, #tpu.memory_space<vmem>>, vector<64x4xf32>
    %c0_12 = arith.constant 0 : index
    %c4 = arith.constant 4 : index
    %13 = vector.load %arg4[%c0_12, %c4] : memref<64x8xf32, #tpu.memory_space<vmem>>, vector<64x2xf32>
    %cst_13 = arith.constant dense<0.000000e+00> : vector<16x64xf32>
    %14 = tpu.matmul %1, %9, %cst_13 {dimension_numbers = #tpu.dot_dimension_numbers<[1], [0], [0], [1], [0, 0, 1, 1], [], []>} : vector<16x4xf32>, vector<4x64xf32>, vector<16x64xf32> -> vector<16x64xf32>
    %cst_14 = arith.constant dense<0.000000e+00> : vector<16x4xf32>
    %15 = tpu.matmul %14, %12, %cst_14 {dimension_numbers = #tpu.dot_dimension_numbers<[1], [0], [0], [1], [0, 0, 1, 1], [], []>} : vector<16x64xf32>, vector<64x4xf32>, vector<16x4xf32> -> vector<16x4xf32>
    %16 = vector.extract_strided_slice %15 {offsets = [0, 0], sizes = [16, 2], strides = [1, 1]} : vector<16x4xf32> to vector<16x2xf32>
    %17 = tpu.transpose %16, [1, 0] : vector<16x2xf32> -> vector<2x16xf32>
    %18 = vector.extract_strided_slice %15 {offsets = [0, 2], sizes = [16, 1], strides = [1, 1]} : vector<16x4xf32> to vector<16x1xf32>
    %19 = vector.extract_strided_slice %17 {offsets = [0, 0], sizes = [1, 16], strides = [1, 1]} : vector<2x16xf32> to vector<1x16xf32>
    %20 = vector.extract_strided_slice %14 {offsets = [0, 0], sizes = [16, 32], strides = [1, 1]} : vector<16x64xf32> to vector<16x32xf32>
    %21 = vector.broadcast %18 : vector<16x1xf32> to vector<16x16xf32>
    %22 = vector.broadcast %19 : vector<1x16xf32> to vector<16x16xf32>
    %23 = arith.addf %21, %22 : vector<16x16xf32>
    %cst_15 = arith.constant 0.000000e+00 : f32
    %24 = vector.broadcast %cst_15 : f32 to vector<16x16xf32>
    %25 = arith.cmpf ogt, %23, %24 : vector<16x16xf32>
    %cst_16 = arith.constant 2.000000e-01 : f32
    %26 = vector.broadcast %cst_16 : f32 to vector<16x16xf32>
    %27 = arith.mulf %26, %23 : vector<16x16xf32>
    %28 = arith.select %25, %23, %27 : vector<16x16xi1>, vector<16x16xf32>
    %29 = arith.addf %28, %8 : vector<16x16xf32>
    %cst_17 = arith.constant dense<0xFF800000> : vector<16xf32>
    %30 = vector.multi_reduction <maximumf>, %29, %cst_17 [1] : vector<16x16xf32> to vector<16xf32>
    %31 = vector.shape_cast %30 : vector<16xf32> to vector<16x1xf32>
    %32 = vector.broadcast %31 : vector<16x1xf32> to vector<16x16xf32>
    %33 = arith.subf %29, %32 : vector<16x16xf32>
    %34 = math.exp %33 : vector<16x16xf32>
    %cst_18 = arith.constant dense<0.000000e+00> : vector<16xf32>
    %35 = vector.multi_reduction <add>, %34, %cst_18 [1] : vector<16x16xf32> to vector<16xf32>
    %36 = vector.shape_cast %35 : vector<16xf32> to vector<16x1xf32>
    %cst_19 = arith.constant 1.000000e-30 : f32
    %37 = vector.broadcast %cst_19 : f32 to vector<16x1xf32>
    %38 = arith.maximumf %36, %37 : vector<16x1xf32>
    %39 = tpu.reciprocal %38 {approx = true} : vector<16x1xf32> -> vector<16x1xf32>
    %40 = vector.broadcast %39 : vector<16x1xf32> to vector<16x16xf32>
    %41 = arith.mulf %34, %40 : vector<16x16xf32>
    %cst_20 = arith.constant dense<0.000000e+00> : vector<16x32xf32>
    %42 = tpu.matmul %41, %20, %cst_20 {dimension_numbers = #tpu.dot_dimension_numbers<[1], [0], [0], [1], [0, 0, 1, 1], [], []>} : vector<16x16xf32>, vector<16x32xf32>, vector<16x32xf32> -> vector<16x32xf32>
    %43 = vector.extract_strided_slice %15 {offsets = [0, 3], sizes = [16, 1], strides = [1, 1]} : vector<16x4xf32> to vector<16x1xf32>
    %44 = vector.extract_strided_slice %17 {offsets = [1, 0], sizes = [1, 16], strides = [1, 1]} : vector<2x16xf32> to vector<1x16xf32>
    %45 = vector.extract_strided_slice %14 {offsets = [0, 32], sizes = [16, 32], strides = [1, 1]} : vector<16x64xf32> to vector<16x32xf32>
    %46 = vector.broadcast %43 : vector<16x1xf32> to vector<16x16xf32>
    %47 = vector.broadcast %44 : vector<1x16xf32> to vector<16x16xf32>
    %48 = arith.addf %46, %47 : vector<16x16xf32>
    %cst_21 = arith.constant 0.000000e+00 : f32
    %49 = vector.broadcast %cst_21 : f32 to vector<16x16xf32>
    %50 = arith.cmpf ogt, %48, %49 : vector<16x16xf32>
    %cst_22 = arith.constant 2.000000e-01 : f32
    %51 = vector.broadcast %cst_22 : f32 to vector<16x16xf32>
    %52 = arith.mulf %51, %48 : vector<16x16xf32>
    %53 = arith.select %50, %48, %52 : vector<16x16xi1>, vector<16x16xf32>
    %54 = arith.addf %53, %8 : vector<16x16xf32>
    %cst_23 = arith.constant dense<0xFF800000> : vector<16xf32>
    %55 = vector.multi_reduction <maximumf>, %54, %cst_23 [1] : vector<16x16xf32> to vector<16xf32>
    %56 = vector.shape_cast %55 : vector<16xf32> to vector<16x1xf32>
    %57 = vector.broadcast %56 : vector<16x1xf32> to vector<16x16xf32>
    %58 = arith.subf %54, %57 : vector<16x16xf32>
    %59 = math.exp %58 : vector<16x16xf32>
    %cst_24 = arith.constant dense<0.000000e+00> : vector<16xf32>
    %60 = vector.multi_reduction <add>, %59, %cst_24 [1] : vector<16x16xf32> to vector<16xf32>
    %61 = vector.shape_cast %60 : vector<16xf32> to vector<16x1xf32>
    %cst_25 = arith.constant 1.000000e-30 : f32
    %62 = vector.broadcast %cst_25 : f32 to vector<16x1xf32>
    %63 = arith.maximumf %61, %62 : vector<16x1xf32>
    %64 = tpu.reciprocal %63 {approx = true} : vector<16x1xf32> -> vector<16x1xf32>
    %65 = vector.broadcast %64 : vector<16x1xf32> to vector<16x16xf32>
    %66 = arith.mulf %59, %65 : vector<16x16xf32>
    %cst_26 = arith.constant dense<0.000000e+00> : vector<16x32xf32>
    %67 = tpu.matmul %66, %45, %cst_26 {dimension_numbers = #tpu.dot_dimension_numbers<[1], [0], [0], [1], [0, 0, 1, 1], [], []>} : vector<16x16xf32>, vector<16x32xf32>, vector<16x32xf32> -> vector<16x32xf32>
    %68 = vector.extract_strided_slice %10 {offsets = [0, 0], sizes = [1, 32], strides = [1, 1]} : vector<1x64xf32> to vector<1x32xf32>
    %69 = vector.broadcast %68 : vector<1x32xf32> to vector<16x32xf32>
    %70 = arith.addf %42, %69 : vector<16x32xf32>
    %cst_27 = arith.constant 0.000000e+00 : f32
    %71 = vector.broadcast %cst_27 : f32 to vector<16x32xf32>
    %72 = arith.cmpf ogt, %70, %71 : vector<16x32xf32>
    %73 = math.exp %70 : vector<16x32xf32>
    %cst_28 = arith.constant 1.000000e+00 : f32
    %74 = vector.broadcast %cst_28 : f32 to vector<16x32xf32>
    %75 = arith.subf %73, %74 : vector<16x32xf32>
    %76 = arith.select %72, %70, %75 : vector<16x32xi1>, vector<16x32xf32>
    %77 = vector.extract_strided_slice %10 {offsets = [0, 32], sizes = [1, 32], strides = [1, 1]} : vector<1x64xf32> to vector<1x32xf32>
    %78 = vector.broadcast %77 : vector<1x32xf32> to vector<16x32xf32>
    %79 = arith.addf %67, %78 : vector<16x32xf32>
    %cst_29 = arith.constant 0.000000e+00 : f32
    %80 = vector.broadcast %cst_29 : f32 to vector<16x32xf32>
    %81 = arith.cmpf ogt, %79, %80 : vector<16x32xf32>
    %82 = math.exp %79 : vector<16x32xf32>
    %cst_30 = arith.constant 1.000000e+00 : f32
    %83 = vector.broadcast %cst_30 : f32 to vector<16x32xf32>
    %84 = arith.subf %82, %83 : vector<16x32xf32>
    %85 = arith.select %81, %79, %84 : vector<16x32xi1>, vector<16x32xf32>
    %c0_31 = arith.constant 0 : index
    %c0_32 = arith.constant 0 : index
    %86 = vector.load %arg3[%c0_31, %c0_32] : memref<72x64xf32, #tpu.memory_space<vmem>>, vector<32x64xf32>
    %cst_33 = arith.constant dense<0.000000e+00> : vector<16x64xf32>
    %87 = tpu.matmul %76, %86, %cst_33 {dimension_numbers = #tpu.dot_dimension_numbers<[1], [0], [0], [1], [0, 0, 1, 1], [], []>} : vector<16x32xf32>, vector<32x64xf32>, vector<16x64xf32> -> vector<16x64xf32>
    %c32 = arith.constant 32 : index
    %c0_34 = arith.constant 0 : index
    %88 = vector.load %arg3[%c32, %c0_34] : memref<72x64xf32, #tpu.memory_space<vmem>>, vector<32x64xf32>
    %cst_35 = arith.constant dense<0.000000e+00> : vector<16x64xf32>
    %89 = tpu.matmul %85, %88, %cst_35 {dimension_numbers = #tpu.dot_dimension_numbers<[1], [0], [0], [1], [0, 0, 1, 1], [], []>} : vector<16x32xf32>, vector<32x64xf32>, vector<16x64xf32> -> vector<16x64xf32>
    %90 = arith.addf %87, %89 : vector<16x64xf32>
    %cst_36 = arith.constant dense<0.000000e+00> : vector<16x2xf32>
    %91 = tpu.matmul %90, %13, %cst_36 {dimension_numbers = #tpu.dot_dimension_numbers<[1], [0], [0], [1], [0, 0, 1, 1], [], []>} : vector<16x64xf32>, vector<64x2xf32>, vector<16x2xf32> -> vector<16x2xf32>
    %92 = vector.extract_strided_slice %91 {offsets = [0, 1], sizes = [16, 1], strides = [1, 1]} : vector<16x2xf32> to vector<16x1xf32>
    %93 = vector.extract_strided_slice %91 {offsets = [0, 0], sizes = [16, 1], strides = [1, 1]} : vector<16x2xf32> to vector<16x1xf32>
    %94 = tpu.transpose %93, [1, 0] : vector<16x1xf32> -> vector<1x16xf32>
    %95 = vector.broadcast %92 : vector<16x1xf32> to vector<16x16xf32>
    %96 = vector.broadcast %94 : vector<1x16xf32> to vector<16x16xf32>
    %97 = arith.addf %95, %96 : vector<16x16xf32>
    %cst_37 = arith.constant 0.000000e+00 : f32
    %98 = vector.broadcast %cst_37 : f32 to vector<16x16xf32>
    %99 = arith.cmpf ogt, %97, %98 : vector<16x16xf32>
    %cst_38 = arith.constant 2.000000e-01 : f32
    %100 = vector.broadcast %cst_38 : f32 to vector<16x16xf32>
    %101 = arith.mulf %100, %97 : vector<16x16xf32>
    %102 = arith.select %99, %97, %101 : vector<16x16xi1>, vector<16x16xf32>
    %103 = arith.addf %102, %8 : vector<16x16xf32>
    %cst_39 = arith.constant dense<0xFF800000> : vector<16xf32>
    %104 = vector.multi_reduction <maximumf>, %103, %cst_39 [1] : vector<16x16xf32> to vector<16xf32>
    %105 = vector.shape_cast %104 : vector<16xf32> to vector<16x1xf32>
    %106 = vector.broadcast %105 : vector<16x1xf32> to vector<16x16xf32>
    %107 = arith.subf %103, %106 : vector<16x16xf32>
    %108 = math.exp %107 : vector<16x16xf32>
    %cst_40 = arith.constant dense<0.000000e+00> : vector<16xf32>
    %109 = vector.multi_reduction <add>, %108, %cst_40 [1] : vector<16x16xf32> to vector<16xf32>
    %110 = vector.shape_cast %109 : vector<16xf32> to vector<16x1xf32>
    %cst_41 = arith.constant 1.000000e-30 : f32
    %111 = vector.broadcast %cst_41 : f32 to vector<16x1xf32>
    %112 = arith.maximumf %110, %111 : vector<16x1xf32>
    %113 = tpu.reciprocal %112 {approx = true} : vector<16x1xf32> -> vector<16x1xf32>
    %114 = vector.broadcast %113 : vector<16x1xf32> to vector<16x16xf32>
    %115 = arith.mulf %108, %114 : vector<16x16xf32>
    %cst_42 = arith.constant dense<0.000000e+00> : vector<16x64xf32>
    %116 = tpu.matmul %115, %90, %cst_42 {dimension_numbers = #tpu.dot_dimension_numbers<[1], [0], [0], [1], [0, 0, 1, 1], [], []>} : vector<16x16xf32>, vector<16x64xf32>, vector<16x64xf32> -> vector<16x64xf32>
    %117 = vector.broadcast %11 : vector<1x64xf32> to vector<16x64xf32>
    %118 = arith.addf %116, %117 : vector<16x64xf32>
    %cst_43 = arith.constant dense<0.000000e+00> : vector<64xf32>
    %119 = vector.multi_reduction <add>, %118, %cst_43 [0] : vector<16x64xf32> to vector<64xf32>
    %120 = vector.shape_cast %119 : vector<64xf32> to vector<1x64xf32>
    %cst_44 = arith.constant 6.250000e-02 : f32
    %121 = vector.broadcast %cst_44 : f32 to vector<1x64xf32>
    %122 = arith.mulf %120, %121 : vector<1x64xf32>
    %c0_45 = arith.constant 0 : index
    %c0_46 = arith.constant 0 : index
    %c0_47 = arith.constant 0 : index
    %123 = vector.load %arg5[%c0_45, %c0_46, %c0_47] : memref<1x1x64xf32, #tpu.memory_space<vmem>>, vector<1x1x64xf32>
    %124 = vector.shape_cast %123 : vector<1x1x64xf32> to vector<1x64xf32>
    %125 = vector.shape_cast %122 : vector<1x64xf32> to vector<1x1x64xf32>
    tpu.vector_store %arg5[%c0_45, %c0_46, %c0_47], %125 {strides = array<i32>} : memref<1x1x64xf32, #tpu.memory_space<vmem>>, vector<1x1x64xf32>,
    return
  }
  func.func @transform_0(%arg0: i32) -> (i32, i32, i32) {
    %c0_i32 = arith.constant 0 : i32
    %c0_i32_0 = arith.constant 0 : i32
    %c0_i32_1 = arith.constant 0 : i32
    return %arg0, %c0_i32, %c0_i32_0 : i32, i32, i32
  }
  func.func @transform_1(%arg0: i32) -> (i32, i32, i32) {
    %c0_i32 = arith.constant 0 : i32
    %c0_i32_0 = arith.constant 0 : i32
    %c0_i32_1 = arith.constant 0 : i32
    return %arg0, %c0_i32, %c0_i32_0 : i32, i32, i32
  }
  func.func @transform_2(%arg0: i32) -> (i32, i32) {
    %c0_i32 = arith.constant 0 : i32
    %c0_i32_0 = arith.constant 0 : i32
    %c0_i32_1 = arith.constant 0 : i32
    return %c0_i32, %c0_i32_0 : i32, i32
  }
  func.func @transform_3(%arg0: i32) -> (i32, i32) {
    %c0_i32 = arith.constant 0 : i32
    %c0_i32_0 = arith.constant 0 : i32
    %c0_i32_1 = arith.constant 0 : i32
    return %c0_i32, %c0_i32_0 : i32, i32
  }
  func.func @transform_4(%arg0: i32) -> (i32, i32, i32) {
    %c0_i32 = arith.constant 0 : i32
    %c0_i32_0 = arith.constant 0 : i32
    %c0_i32_1 = arith.constant 0 : i32
    return %arg0, %c0_i32, %c0_i32_0 : i32, i32, i32
  }
}

</mosaic_0001>

<bundles_post_ra>
// kernel: pathway_encoder.1
= control target key start
LH: loop header
LB: loop body
LE: loop exit
PB: predicated region body
PF: predicated region fallthrough
CT: control target
= control target key end

     0   :  { %9 = vsyncpa [#allocation3], 0  ;;  %s1966_s0 = inlined_call_operand.vmem [shape: f32[8,16,4], index: 0, kind: input, shape index: {}]   ;;  %s1967_s1 = inlined_call_operand.vmem [shape: f32[8,16,16], index: 1, kind: input, shape index: {}]   ;;  %s1968_s2 = inlined_call_operand.vmem [shape: f32[72,64], index: 2, kind: input, shape index: {}]   ;;  %s1969_s3 = inlined_call_operand.vmem [shape: f32[64,8], index: 3, kind: input, shape index: {}]   ;;  %s1970_s4 = inlined_call_operand.hbm [shape: f32[8,1,64], index: 4, kind: output, shape index: {}]  }
   0x1   :  { %11 = vsyncpa [#allocation3 + $0x1], 0  ;;  %s1700_s15 = smov 0   ;;  %s1702_s16 = smov 0  }
   0x2   :  { %s1704_s17 = smov 0   ;;  %s1706_s18 = smov 0  }
   0x3 LB: > { %s1721_s19 = sadd.s32 4294967295, %s1666_s18   ;;  %s1266_s20 = sadd.s32 4294967294, %s1666_s18   ;;  %s1666_s18 = sphi %s1706_s18, %s1976_s18   ;;  %s1662_s17 = sphi %s1704_s17, %s1975_s17   ;;  %s1658_s16 = sphi %s1702_s16, %s1974_s16   ;;  %s1654_s15 = sphi %s1700_s15, %s1973_s15  }
   0x4   : > { %s1725_s21 = sadd.s32 1, %s1666_s18   ;;  %s118_s22 = sadd.s32 1, %s1662_s17 }
   0x5   : > { %s115_s23 = ssub.s32 %s1666_s18, %s1725_s21  ;;  %p128_p0 = scmp.ne.s32.totalorder %s1662_s17, %s1658_s16 }
   0x6   : > { %p116_p1 = scmp.eq.s32.totalorder %s115_s23, 0  ;;  %p129_p2 = scmp.eq.s32.totalorder %s1721_s19, 7 }
   0x7   : > { %p134_p3 = scmp.ne.s32.totalorder %s1658_s16, %s1654_s15  ;;  %p135_p4 = scmp.eq.s32.totalorder %s1266_s20, 7 }
   0x8   : > { %s1736_s24 = scalar_select %p116_p1, %s1662_s17, %s118_s22  }
   0x9   : > { %p1738_p5 = por %p129_p2, %p128_p0  ;;  %p1742_p6 = por %p135_p4, %p134_p3 }
   0xa   : > { %p1269_p7 = scmp.ge.s32.totalorder %s1666_s18, 1  ;;  %p175_p8 = scmp.lt.s32.totalorder %s1666_s18, 9 }
   0xc   : > { %p176_p9 = pnand %p1269_p7, %p175_p8 }
   0xd   : > { %v223_v0 = vld [vmem:[%s1968_s2 + $0x40] sm:$0xf] (!%p176_p9)  ;;  %vm241_vm0 = vcmask (!%p176_p9), 1043456   ;;  %p205_p10 = scmp.lt.s32.totalorder (!%p176_p9), %s1721_s19, 7  ;;  %v1760_v2 = vld [vmem:[%s1969_s3 + $0x8] sm:$0xff] (!%p176_p9)  ;;  %v1765_v3 = vld [vmem:[%s1969_s3 + $0x10] sm:$0xff] (!%p176_p9)  ;;  %v444_v24 = vlaneseq (!%p176_p9) }
   0xe   : > { %179 = sbr.rel (%p176_p9) target bundleno = 2329 (0x919), region = 36  ;;  %v1755_v1 = vld [vmem:[%s1969_s3] sm:$0xff] (!%p176_p9)  ;;  %1349 = vmatprep.subr.msk.mxu0 (!%p176_p9), %vm241_vm0, %v223_v0  ;;  %v1770_v4 = vld [vmem:[%s1969_s3 + $0x18] sm:$0xff] (!%p176_p9)  ;;  %v1789_v9 = vld [vmem:[%s1969_s3 + $0x28] sm:$0xff] (!%p176_p9)  ;;  %vm234_vm1 = vcmask (!%p176_p9), 31744   ;;  %v1668_v16 = vmov (!%p176_p9), 2  }
   0xf   : > { %1350 = vmatpush3.msk.msra.mxu0 (!%p176_p9), %vm241_vm0, %v223_v0  ;;  %v1550_v5 = vpack.i.bf16 (!%p176_p9), %v1760_v2, %v1755_v1  ;;  %v1435_v6 = vpack.c.bf16 (!%p176_p9), %v1760_v2, %v1755_v1  ;;  %v1439_v7 = vpack.c.bf16 (!%p176_p9), %v1770_v4, %v1765_v3  ;;  %v1784_v8 = vld [vmem:[%s1969_s3 + $0x20] sm:$0xff] (!%p176_p9)  ;;  %v1802_v13 = vld [vmem:[%s1969_s3 + $0x30] sm:$0xff] (!%p176_p9)  ;;  %v1807_v14 = vld [vmem:[%s1969_s3 + $0x38] sm:$0xff] (!%p176_p9)  ;;  %1543 = vset.pattern.permute.xlu0 (!%p176_p9), %v1668_v16  ;;  %vm320_vm2 = vcmask (!%p176_p9), 523264   ;;  %s1671_s10 = smov (!%p176_p9), 96   ;;  %s1672_s8 = smov (!%p176_p9), 124  }
  0x10   : > { %v1443_v12 = vpack.c.bf16 (!%p176_p9), %v1789_v9, %v1784_v8  ;;  %v1447_v15 = vpack.c.bf16 (!%p176_p9), %v1807_v14, %v1802_v13  ;;  %v1669_v21 = vmov (!%p176_p9), 3   ;;  %v1823_v26 = vshrl.u32 (!%p176_p9), %v444_v24, 7  ;;  %s203_s20 = sand.u32 (!%p176_p9), 1, %s1658_s16  }
  0x11   : > { %1436 = vmatprep.subr.bf16.mxu1 (!%p176_p9), %v1435_v6  ;;  %1544 = vset.pattern.permute.xlu1 (!%p176_p9), %v1669_v21  ;;  %v1670_v41 = vmov (!%p176_p9), -1e+30   ;;  %vm458_vm8 = vcmask (!%p176_p9), 130048   ;;  %vm733_vm10 = vcmask (!%p176_p9), 261120   ;;  %s204_s23 = scalar_lea.vmem (!%p176_p9), [#allocation2], %s203_s20  ;;  %s1187_s5 = scalar_lea.sflag (!%p176_p9), [#allocation3], %s203_s20 }
  0x12   : > { %1438 = vmatpush3.bf16.msra.mxu1 (!%p176_p9), %v1435_v6  ;;  %v446_v30 = vsub.s32 (!%p176_p9), 0, %v1823_v26  ;;  %v493_v31 = vsub.s32 (!%p176_p9), 1, %v1823_v26  ;;  %s1199_s27 = sshll.u32 (!%p176_p9), %s204_s23, 4  ;;  %s1926_s27 = int_to_ptr.vmem [resolvable:$true] %s1199_s27 }
  0x13   : > { %1440 = vmatprep.subr.bf16.mxu1 (!%p176_p9), %v1439_v7  ;;  %s1604_s6 = scalar_lea.vmem (!%p176_p9), %s1926_s27, 16 }
  0x14   : > { %p1605_p11 = scmp.ne.s32.totalorder (!%p176_p9), %s1926_s27, %s1604_s6 }
  0x15   : > { %s1773_s11 = scalar_select %p205_p10, %s1721_s19, 7 }
  0x16   : > { %1442 = vmatpush3.bf16.msra.mxu1 %v1439_v7  ;;  %p1606_p12 = pnand %p1605_p11, %p1738_p5 }
  0x17   : > { %s1300_s22 = sshll.u32 %s1773_s11, 4  ;;  %1444 = vmatprep.subr.bf16.mxu1 %v1443_v12 }
  0x18   : > { %s209_s28 = scalar_lea.vmem %s1966_s0, %s1300_s22  ;;  %s214_s9 = scalar_lea.vmem %s1967_s1, %s1300_s22 }
  0x19   : > { %v215_v10 = vld [vmem:[%s209_s28] sm:$0xff]  ;;  %v216_v11 = vld [vmem:[%s209_s28 + $0x8] sm:$0xff]  ;;  %s1297_s22 = sshll.u32 %s1721_s19, 4  ;;  %p1607_p13 = pneg %p1606_p12 }
  0x1a   : > { %1351 = vmatprep.mubr.msk.f32.mxu0 %vm234_vm1, %v215_v10  ;;  %1446 = vmatpush3.bf16.msra.mxu1 %v1443_v12  ;;  %v217_v29 = vld [vmem:[%s214_s9] sm:$0xff]  ;;  %v218_v32 = vld [vmem:[%s214_s9 + $0x8] sm:$0xff]  ;;  %s1924_s30 = scalar_lea.hbm %s1970_s4, %s1297_s22  ;;  %s1674_s19 = smov [#allocation2]  }
  0x1b   : > { %1352 = vmatmul.mubr.msk.f32.vlgmr.msra.gmra.mrb[0].mxu0 %vm234_vm1, %v216_v11  ;;  %1448 = vmatprep.subr.bf16.mxu1 %v1447_v15  ;;  %vm219_vm3 = vcmp.gt.f32.partialorder %v217_v29, 0.0  ;;  %vm220_vm4 = vcmp.gt.f32.partialorder %v218_v32, 0.0  ;;  %v1856_v29 = vld [vmem:[%s1968_s2 + $0x44] ss:$0 sm:$0xff]  ;;  %vm1184_vm1 = vcmask 516096   ;;  %s1608_s7 = sshll.u32 %s1674_s19, 4  ;;  %s1609_s7 = int_to_ptr.vmem [resolvable:$false] %s1608_s7 }
  0x1c   : > { %v1834_v42 = vsel %vm220_vm4, 0.0, %v1670_v41  ;;  %v1836_v43 = vsel %vm219_vm3, 0.0, %v1670_v41  ;;  %p1611_p0 = scmp.lt.s32.totalorder %s1926_s27, %s1609_s7 }
  0x1e   : > { %1450 = vmatpush3.bf16.msra.mxu1 %v1447_v15 }
  0xee   : > { %v1811_v17 = vpop.f32.mrb[0].mxu0 }
  0xef   : > { %v1813_v18 = vpop.f32.mrb[1].mxu0 }
  0xf0   : > { %v1545_v19 = vpack.i.bf16 %v1811_v17, %v1813_v18  ;;  %v1451_v20 = vpack.c.bf16 %v1811_v17, %v1813_v18  ;;  %1370 = vmatprep.mubr.msk.f32.mxu1 %vm320_vm2, %v1813_v18 }
  0xf1   : > { %1371 = vmatmul.mubr.msk.f32.vlgmr.msra.gmra.mrb[0].mxu1 %vm320_vm2, %v1811_v17 }
  0xf2   : > { %1452 = vmatprep.subr.bf16.mxu0 %v1451_v20 }
  0xf3   : > { %1454 = vmatpush3.bf16.msra.mxu0 %v1451_v20 }
 0x1c4   : > { %v1372_v22 = vpop.f32.mrb[0].mxu1 }
 0x1c5   : > { %441 = vperm.xlu0 %1543, %v1372_v22   ;;  %v393_v23 = vpop.f32.mrb[1].mxu1 }
 0x1c6   : > { %484 = vperm.xlu1 %1544, %v393_v23  }
 0x1c9   : > { %436 = vperm.xlu0 %1543, %v393_v23  }
 0x1ca   : > { %488 = vperm.xlu1 %1544, %v1372_v22  }
 0x1e7   : > { %402 = vxpose.xlu0.b32.start [1/2] (short) (narrow) %v393_v23, 8 }
 0x1eb   : > { %403 = vxpose.xlu0.b32.end [2/2] (short) (narrow) %v1372_v22, 8 }
 0x244   : > { %v442_v25 = vpop.permute.xlu0 %441 }
 0x245   : > { %v485_v27 = vpop.permute.xlu1 %484 }
 0x248   : > { %v437_v28 = vpop.permute.xlu0 %436 }
 0x249   : > { %v489_v36 = vpop.permute.xlu1 %488 }
 0x267   : > { %v418_v33 = vpop.trf.xlu0 }
 0x268   : > { %v447_v34 = vrot.slane %v418_v33, %v446_v30  ;;  %v494_v35 = vrot.slane %v418_v33, %v493_v31 }
 0x26a   : > { %v448_v37 = vadd.f32 %v447_v34, %v437_v28  ;;  %v449_v38 = vadd.f32 %v447_v34, %v442_v25  ;;  %v495_v39 = vadd.f32 %v494_v35, %v485_v27  ;;  %v496_v40 = vadd.f32 %v494_v35, %v489_v36 }
 0x26c   : > { %vm451_vm5 = vcmp.gt.f32.partialorder %v449_v38, 0.0  ;;  %v453_v44 = vmul.f32 0.2, %v449_v38  ;;  %vm450_vm6 = vcmp.gt.f32.partialorder %v448_v37, 0.0  ;;  %v452_v45 = vmul.f32 0.2, %v448_v37 }
 0x26d   : > { %vm497_vm7 = vcmp.gt.f32.partialorder %v495_v39, 0.0  ;;  %v499_v46 = vmul.f32 0.2, %v495_v39  ;;  %v500_v49 = vmul.f32 0.2, %v496_v40  ;;  %vm498_vm9 = vcmp.gt.f32.partialorder %v496_v40, 0.0 }
 0x26e   : > { %v455_v47 = vsel %vm451_vm5, %v449_v38, %v453_v44  ;;  %v454_v48 = vsel %vm450_vm6, %v448_v37, %v452_v45 }
 0x26f   : > { %v457_v50 = vadd.f32 %v455_v47, %v1834_v42  ;;  %v456_v51 = vadd.f32 %v454_v48, %v1836_v43  ;;  %v501_v52 = vsel %vm497_vm7, %v495_v39, %v499_v46  ;;  %v502_v56 = vsel %vm498_vm9, %v496_v40, %v500_v49 }
 0x270   : > { %v503_v55 = vadd.f32 %v501_v52, %v1836_v43  ;;  %v504_v58 = vadd.f32 %v502_v56, %v1834_v42  ;;  %v725_v56 = vld [vmem:[%s1968_s2] sm:$0xff] }
 0x271   : > { %v462_v53 = vsel %vm458_vm8, %v457_v50, -inf  ;;  %v459_v54 = vsel %vm458_vm8, %v456_v51, -inf }
 0x272   : > { %463 = vmax.xlane.f32.xlu0 %v462_v53  ;;  %460 = vmax.xlane.f32.xlu1 %v459_v54  ;;  %v505_v57 = vsel %vm458_vm8, %v503_v55, -inf  ;;  %v508_v59 = vsel %vm458_vm8, %v504_v58, -inf  ;;  %v731_v53 = vld [vmem:[%s1968_s2 + $0x30] sm:$0xff]  ;;  %v732_v54 = vld [vmem:[%s1968_s2 + $0x38] sm:$0xff] }
 0x276   : > { %506 = vmax.xlane.f32.xlu1 %v505_v57  ;;  %v726_v57 = vld [vmem:[%s1968_s2 + $0x8] sm:$0xff] }
 0x27a   : > { %509 = vmax.xlane.f32.xlu1 %v508_v59  ;;  %v1555_v59 = vpack.i.bf16 %v1770_v4, %v1765_v3 }
 0x288   : > { %1551 = vrot.lane.b32.xlu0 %v1550_v5, %s1672_s8 }
 0x2ff   : > { %v464_v60 = vpop.xlane.xlu0 %463  ;;  %v461_v61 = vpop.xlane.xlu1 %460 }
 0x300   : > { %v466_v62 = vsub.f32 %v457_v50, %v464_v60  ;;  %v465_v6 = vsub.f32 %v456_v51, %v461_v61  ;;  %v729_v50 = vld [vmem:[%s1968_s2 + $0x20] sm:$0xff]  ;;  %v730_v51 = vld [vmem:[%s1968_s2 + $0x28] sm:$0xff]  ;;  %v1560_v60 = vpack.i.bf16 %v1789_v9, %v1784_v8  ;;  %v1565_v61 = vpack.i.bf16 %v1807_v14, %v1802_v13 }
 0x301   : > { %v1459_v52 = vpack.c.bf16 %v730_v51, %v729_v50 }
 0x302   : > { %v469_v63 = vmul.f32 1.442695, %v466_v62  ;;  %v467_v11 = vmul.f32 1.442695, %v465_v6 }
 0x303   : > { %v507_v0 = vpop.xlane.xlu1 %506 }
 0x304   : > { %1572 = vpow2.f32 %v469_v63  ;;  %v511_v12 = vsub.f32 %v503_v55, %v507_v0  ;;  %v1463_v55 = vpack.c.bf16 %v732_v54, %v731_v53 }
 0x306   : > { %v513_v20 = vmul.f32 1.442695, %v511_v12 }
 0x307   : > { %v510_v7 = vpop.xlane.xlu1 %509 }
 0x308   : > { %v512_v10 = vsub.f32 %v504_v58, %v510_v7  ;;  %v1467_v58 = vpack.c.bf16 %v726_v57, %v725_v56 }
 0x30a   : > { %v515_v15 = vmul.f32 1.442695, %v512_v10 }
 0x30c   : > { %1574 = vpow2.f32 %v515_v15  ;;  %v727_v15 = vld [vmem:[%s1968_s2 + $0x10] sm:$0xff] }
 0x30d   : > { %1576 = vpow2.f32 %v467_v11 }
 0x30e   : > { %v1573_v16 = vpop.eup %1572  ;;  %1578 = vpow2.f32 %v513_v20  ;;  %v1552_v20 = vpop.permute.xlu0 %1551 }
 0x30f   : > { %v474_v21 = vsel %vm458_vm8, %v1573_v16, 0.0 }
 0x310   : > { %475 = vadd.xlane.f32.xlu1 %v474_v21 }
 0x316   : > { %v1575_v22 = vpop.eup %1574 }
 0x317   : > { %v520_v23 = vsel %vm458_vm8, %v1575_v22, 0.0  ;;  %v1577_v24 = vpop.eup %1576 }
 0x318   : > { %521 = vadd.xlane.f32.xlu1 %v520_v23  ;;  %v471_v25 = vsel %vm458_vm8, %v1577_v24, 0.0  ;;  %v1579_v27 = vpop.eup %1578  ;;  %v1554_v23 = vunpack.i.h.bf16 %v1552_v20 }
 0x319   : > { %v517_v28 = vsel %vm458_vm8, %v1579_v27, 0.0 }
 0x31c   : > { %472 = vadd.xlane.f32.xlu1 %v471_v25 }
 0x320   : > { %518 = vadd.xlane.f32.xlu1 %v517_v28 }
 0x331   : > { %1546 = vrot.lane.b32.xlu1 %v1545_v19, %s1671_s10 }
 0x335   : > { %631 = vrot.lane.b32.xlu1 %v1856_v29, %s1671_s10 }
 0x339   : > { %1556 = vrot.lane.b32.xlu1 %v1555_v59, %s1672_s8 }
 0x33d   : > { %1561 = vrot.lane.b32.xlu1 %v1560_v60, %s1672_s8 }
 0x341   : > { %1566 = vrot.lane.b32.xlu1 %v1565_v61, %s1672_s8  ;;  %s1610_s8 = scalar_lea.vmem %s1609_s7, 32 }
 0x342   : > { %p1612_p1 = scmp.lt.s32.totalorder %s1610_s8, %s1604_s6 }
 0x344   : > { %p1613_p2 = por %p1612_p1, %p1611_p0 }
 0x346   : > { %p1614_p3 = pnand %p1613_p2, %p1607_p13 }
 0x39d   : > { %v476_v31 = vpop.xlane.xlu1 %475 }
 0x39e   : > { %v478_v33 = vmax.f32 %v476_v31, 1e-30 }
 0x3a0   : > { %1580 = vrcp.f32 %v478_v33 }
 0x3a5   : > { %v522_v32 = vpop.xlane.xlu1 %521 }
 0x3a6   : > { %v524_v36 = vmax.f32 %v522_v32, 1e-30 }
 0x3a9   : > { %v473_v34 = vpop.xlane.xlu1 %472 }
 0x3aa   : > { %v477_v35 = vmax.f32 %v473_v34, 1e-30  ;;  %v1581_v40 = vpop.eup %1580 }
 0x3ab   : > { %v482_v45 = vmul.f32 %v1581_v40, %v1573_v16  ;;  %v728_v16 = vld [vmem:[%s1968_s2 + $0x18] sm:$0xff] }
 0x3ac   : > { %1582 = vrcp.f32 %v477_v35  ;;  %v1471_v31 = vpack.c.bf16 %v728_v16, %v727_v15  ;;  %v1294_v16 = vld [vmem:[%s1968_s2 + $0x45] ss:$0 sm:$0xff] }
 0x3ad   : > { %v519_v37 = vpop.xlane.xlu1 %518  ;;  %1584 = vrcp.f32 %v524_v36 }
 0x3ae   : > { %v523_v38 = vmax.f32 %v519_v37, 1e-30 }
 0x3b0   : > { %1586 = vrcp.f32 %v523_v38 }
 0x3b1   : > { %v1547_v17 = vpop.permute.xlu1 %1546 }
 0x3b2   : > { %v1549_v18 = vunpack.i.h.bf16 %v1547_v17  ;;  %v1548_v19 = vunpack.i.l.bf16 %v1547_v17 }
 0x3b4   : > { %v1455_v39 = vpack.c.bf16 %v1549_v18, %v1548_v19 }
 0x3b5   : > { %v632_v6 = vpop.permute.xlu1 %631 }
 0x3b6   : > { %v1583_v41 = vpop.eup %1582  ;;  %1456 = vmatprep.subr.bf16.mxu0 %v1455_v39 }
 0x3b7   : > { %v481_v44 = vmul.f32 %v1583_v41, %v1577_v24  ;;  %v1585_v46 = vpop.eup %1584  ;;  %v1553_v24 = vunpack.i.l.bf16 %v1552_v20 }
 0x3b8   : > { %v528_v49 = vmul.f32 %v1585_v46, %v1575_v22 }
 0x3b9   : > { %1377 = vmatprep.mubr.msk.f32.mxu0 %vm458_vm8, %v481_v44  ;;  %v1557_v25 = vpop.permute.xlu1 %1556  ;;  %v1475_v32 = vpack.c.bf16 %v1554_v23, %v1553_v24 }
 0x3ba   : > { %v1587_v47 = vpop.eup %1586  ;;  %1378 = vmatmul.mubr.msk.f32.vlgmr.msra.gmra.mrb[2].mxu0 %vm458_vm8, %v482_v45  ;;  %v1558_v28 = vunpack.i.l.bf16 %v1557_v25 }
 0x3bb   : > { %1458 = vmatpush3.bf16.msra.mxu0 %v1455_v39  ;;  %v527_v48 = vmul.f32 %v1587_v47, %v1579_v27  ;;  %v1559_v27 = vunpack.i.h.bf16 %v1557_v25  ;;  %1476 = vmatprep.subr.bf16.mxu1 %v1475_v32 }
 0x3bc   : > { %1460 = vmatprep.subr.bf16.mxu0 %v1459_v52  ;;  %1478 = vmatpush3.bf16.msra.mxu1 %v1475_v32 }
 0x3bd   : > { %1384 = vmatprep.mubr.msk.f32.mxu0 %vm458_vm8, %v527_v48  ;;  %v1479_v34 = vpack.c.bf16 %v1559_v27, %v1558_v28  ;;  %v1562_v37 = vpop.permute.xlu1 %1561 }
 0x3be   : > { %1385 = vmatmul.mubr.msk.f32.vlgmr.msra.gmra.mrb[4].mxu0 %vm458_vm8, %v528_v49  ;;  %v1564_v38 = vunpack.i.h.bf16 %v1562_v37  ;;  %v1563_v17 = vunpack.i.l.bf16 %v1562_v37  ;;  %v1673_v49 = vmov 1  }
 0x3bf   : > { %1462 = vmatpush3.bf16.msra.mxu0 %v1459_v52  ;;  %1480 = vmatprep.subr.bf16.mxu1 %v1479_v34 }
 0x3c0   : > { %1464 = vmatprep.subr.bf16.mxu0 %v1463_v55  ;;  %v1483_v19 = vpack.c.bf16 %v1564_v38, %v1563_v17  ;;  %1482 = vmatpush3.bf16.msra.mxu1 %v1479_v34 }
 0x3c1   : > { %v1567_v39 = vpop.permute.xlu1 %1566  ;;  %1570 = vset.pattern.permute.xlu1 %v1673_v49 }
 0x3c2   : > { %v1569_v40 = vunpack.i.h.bf16 %v1567_v39  ;;  %v1568_v41 = vunpack.i.l.bf16 %v1567_v39  ;;  %1484 = vmatprep.subr.bf16.mxu1 %v1483_v19 }
 0x3c3   : > { %1466 = vmatpush3.bf16.msra.mxu0 %v1463_v55 }
 0x3c4   : > { %1468 = vmatprep.subr.bf16.mxu0 %v1467_v58  ;;  %v1487_v45 = vpack.c.bf16 %v1569_v40, %v1568_v41  ;;  %1486 = vmatpush3.bf16.msra.mxu1 %v1483_v19 }
 0x3c6   : > { %1488 = vmatprep.subr.bf16.mxu1 %v1487_v45 }
 0x3c8   : > { %1490 = vmatpush3.bf16.msra.mxu1 %v1487_v45 }
 0x48d   : > { %v1379_v62 = vpop.f32.mrb[2].mxu0 }
 0x48e   : > { %v605_v63 = vpop.f32.mrb[3].mxu0  ;;  %v611_v2 = vadd.f32 %v1379_v62, %v1856_v29 }
 0x48f   : > { %v606_v0 = vadd.f32 %v1856_v29, %v605_v63 }
 0x490   : > { %v618_v9 = vmul.f32 1.442695, %v611_v2  ;;  %vm615_vm14 = vcmp.gt.f32.partialorder %v611_v2, 0.0 }
 0x491   : > { %v616_v3 = vmul.f32 1.442695, %v606_v0  ;;  %v1386_v4 = vpop.f32.mrb[4].mxu0  ;;  %vm614_vm13 = vcmp.gt.f32.partialorder %v606_v0, 0.0 }
 0x492   : > { %v712_v7 = vadd.f32 %v1386_v4, %v632_v6  ;;  %v706_v10 = vpop.f32.mrb[5].mxu0 }
 0x493   : > { %v707_v1 = vadd.f32 %v706_v10, %v632_v6  ;;  %1588 = vpow2.f32 %v616_v3 }
 0x494   : > { %v719_v5 = vmul.f32 1.442695, %v712_v7  ;;  %vm716_vm12 = vcmp.gt.f32.partialorder %v712_v7, 0.0 }
 0x495   : > { %v717_v8 = vmul.f32 1.442695, %v707_v1  ;;  %vm715_vm11 = vcmp.gt.f32.partialorder %v707_v1, 0.0 }
 0x496   : > { %1590 = vpow2.f32 %v719_v5 }
 0x497   : > { %1592 = vpow2.f32 %v717_v8 }
 0x498   : > { %1594 = vpow2.f32 %v618_v9 }
 0x49d   : > { %v1589_v13 = vpop.eup %1588 }
 0x49e   : > { %v1282_v22 = vadd.f32 -1.0, %v1589_v13 }
 0x4a0   : > { %v1591_v14 = vpop.eup %1590  ;;  %v622_v36 = vsel %vm614_vm13, %v606_v0, %v1282_v22 }
 0x4a1   : > { %v1593_v11 = vpop.eup %1592  ;;  %v1287_v12 = vadd.f32 -1.0, %v1591_v14 }
 0x4a2   : > { %v1286_v21 = vadd.f32 -1.0, %v1593_v11  ;;  %v1595_v35 = vpop.eup %1594 }
 0x4a3   : > { %v724_v33 = vsel %vm716_vm12, %v712_v7, %v1287_v12  ;;  %v1283_v18 = vadd.f32 -1.0, %v1595_v35 }
 0x4a4   : > { %v723_v29 = vsel %vm715_vm11, %v707_v1, %v1286_v21 }
 0x4a5   : > { %1395 = vmatprep.mubr.msk.f32.mxu0 %vm733_vm10, %v723_v29  ;;  %v623_v44 = vsel %vm615_vm14, %v611_v2, %v1283_v18 }
 0x4a6   : > { %1396 = vmatmul.mubr.msk.f32.vlgmr.msra.gmra.mrb[6].mxu0 %vm733_vm10, %v724_v33 }
 0x4a7   : > { %1470 = vmatpush3.bf16.msra.mxu0 %v1467_v58  ;;  %1406 = vmatprep.mubr.msk.f32.mxu0 %vm733_vm10, %v622_v36 }
 0x4a8   : > { %1472 = vmatprep.subr.bf16.mxu0 %v1471_v31 }
 0x4ab   : > { %1474 = vmatpush3.bf16.msra.mxu0 %v1471_v31 }
 0x4ae   : > { %1407 = vmatmul.mubr.msk.f32.vlgmr.msra.gmra.mrb[6].mxu0 %vm733_vm10, %v623_v44 }
 0x581   : > { %v1408_v46 = vpop.f32.mrb[6].mxu0 }
 0x582   : > { %v887_v47 = vpop.f32.mrb[7].mxu0 }
 0x583   : > { %v1491_v48 = vpack.c.bf16 %v1408_v46, %v887_v47  ;;  %1425 = vmatprep.mubr.msk.f32.mxu1 %vm320_vm2, %v887_v47 }
 0x584   : > { %1426 = vmatmul.mubr.msk.f32.vlgmr.msra.gmra.mrb[2].mxu1 %vm320_vm2, %v1408_v46 }
 0x585   : > { %1492 = vmatprep.subr.bf16.mxu0 %v1491_v48 }
 0x586   : > { %1494 = vmatpush3.bf16.msra.mxu0 %v1491_v48 }
 0x657   : > { %v1427_v50 = vpop.f32.mrb[2].mxu1 }
 0x658   : > { %v1000_v51 = vpop.f32.mrb[3].mxu1 }
 0x659   : > { %1009 = vxpose.xlu0.b32.start [1/2] (short) (narrow) %v1000_v51, 8  ;;  %1043 = vperm.xlu1 %1570, %v1000_v51  }
 0x65d   : > { %1010 = vxpose.xlu0.b32.end [2/2] (short) (narrow) %v1427_v50, 8  ;;  %1048 = vperm.xlu1 %1570, %v1427_v50  }
 0x686   : > { %1571 = vset.pattern.permute.xlu0 %v1673_v49 }
 0x6d8   : > { %v1044_v52 = vpop.permute.xlu1 %1043 }
 0x6d9   : > { %v1025_v53 = vpop.trf.xlu0 }
 0x6da   : > { %v1054_v54 = vrot.slane %v1025_v53, %v446_v30 }
 0x6dc   : > { %v1055_v55 = vadd.f32 %v1054_v54, %v1044_v52  ;;  %v1049_v56 = vpop.permute.xlu1 %1048 }
 0x6dd   : > { %v1056_v57 = vadd.f32 %v1054_v54, %v1049_v56 }
 0x6de   : > { %v1059_v58 = vmul.f32 0.2, %v1055_v55  ;;  %vm1057_vm15 = vcmp.gt.f32.partialorder %v1055_v55, 0.0 }
 0x6df   : > { %vm1058_vm0 = vcmp.gt.f32.partialorder %v1056_v57, 0.0  ;;  %v1060_v59 = vmul.f32 0.2, %v1056_v57 }
 0x6e0   : > { %v1061_v60 = vsel %vm1057_vm15, %v1055_v55, %v1059_v58 }
 0x6e1   : > { %v1063_v61 = vadd.f32 %v1061_v60, %v1836_v43  ;;  %v1062_v62 = vsel %vm1058_vm0, %v1056_v57, %v1060_v59 }
 0x6e2   : > { %v1064_v63 = vadd.f32 %v1062_v62, %v1834_v42 }
 0x6e3   : > { %v1065_v0 = vsel %vm458_vm8, %v1063_v61, -inf }
 0x6e4   : > { %1066 = vmax.xlane.f32.xlu1 %v1065_v0  ;;  %v1068_v6 = vsel %vm458_vm8, %v1064_v63, -inf }
 0x6e5   : > { %1069 = vmax.xlane.f32.xlu0 %v1068_v6 }
 0x771   : > { %v1067_v26 = vpop.xlane.xlu1 %1066 }
 0x772   : > { %v1071_v30 = vsub.f32 %v1063_v61, %v1067_v26  ;;  %v1070_v3 = vpop.xlane.xlu0 %1069 }
 0x773   : > { %v1072_v4 = vsub.f32 %v1064_v63, %v1070_v3 }
 0x774   : > { %v1073_v7 = vmul.f32 1.442695, %v1071_v30 }
 0x775   : > { %v1075_v10 = vmul.f32 1.442695, %v1072_v4 }
 0x776   : > { %1596 = vpow2.f32 %v1073_v7 }
 0x777   : > { %1598 = vpow2.f32 %v1075_v10 }
 0x780   : > { %v1597_v1 = vpop.eup %1596 }
 0x781   : > { %v1077_v43 = vsel %vm458_vm8, %v1597_v1, 0.0  ;;  %v1599_v2 = vpop.eup %1598 }
 0x782   : > { %1078 = vadd.xlane.f32.xlu1 %v1077_v43  ;;  %v1080_v42 = vsel %vm458_vm8, %v1599_v2, 0.0 }
 0x786   : > { %1081 = vadd.xlane.f32.xlu1 %v1080_v42 }
 0x80f   : > { %v1079_v5 = vpop.xlane.xlu1 %1078 }
 0x810   : > { %v1083_v8 = vmax.f32 %v1079_v5, 1e-30 }
 0x812   : > { %1600 = vrcp.f32 %v1083_v8 }
 0x813   : > { %v1082_v9 = vpop.xlane.xlu1 %1081 }
 0x814   : > { %v1084_v13 = vmax.f32 %v1082_v9, 1e-30 }
 0x816   : > { %1602 = vrcp.f32 %v1084_v13 }
 0x81c   : > { %v1601_v14 = vpop.eup %1600 }
 0x81d   : > { %v1087_v11 = vmul.f32 %v1601_v14, %v1597_v1 }
 0x81f   : > { %1432 = vmatprep.mubr.msk.f32.mxu0 %vm458_vm8, %v1087_v11 }
 0x820   : > { %v1603_v12 = vpop.eup %1602 }
 0x821   : > { %v1088_v15 = vmul.f32 %v1603_v12, %v1599_v2 }
 0x823   : > { %1433 = vmatmul.mubr.msk.f32.vlgmr.msra.gmra.mrb[8].mxu0 %vm458_vm8, %v1088_v15 }
 0x8f6   : > { %v1434_v20 = vpop.f32.mrb[8].mxu0 }
 0x8f7   : > { %v1171_v21 = vadd.f32 %v1434_v20, %v1294_v16  ;;  %v1165_v22 = vpop.f32.mrb[9].mxu0 }
 0x8f8   : > { %v1166_v23 = vadd.f32 %v1294_v16, %v1165_v22 }
 0x8f9   : > { %v1175_v24 = vsel %vm320_vm2, %v1171_v21, 0.0 }
 0x8fa   : > { %v1174_v25 = vsel %vm320_vm2, %v1166_v23, 0.0 }
 0x8fb   : > { %v1176_v27 = vadd.f32 %v1175_v24, %v1174_v25 }
 0x8fd   : > { %v1177_v28 = vrot.slane %v1176_v27, 4 }
 0x8ff   : > { %v1178_v29 = vadd.f32 %v1177_v28, %v1176_v27 }
 0x901   : > { %v1179_v31 = vrot.slane %v1178_v29, 2 }
 0x903   : > { %v1180_v32 = vadd.f32 %v1179_v31, %v1178_v29 }
 0x905   : > { %v1181_v33 = vrot.slane %v1180_v32, 1 }
 0x907   : > { %v1182_v34 = vadd.f32 %v1181_v33, %v1180_v32 }
 0x909   : > { %v1183_v35 = vmul.f32 0.0625, %v1182_v34 }
 0x90b   : > { %1185 = vst.msk [vmem:[%s204_s23] sm:$0x1] %vm1184_vm1, %v1183_v35 }
 0x90c   : > { %1617 = shalt.err (!%p1614_p3)
}
 0x90d   : > { %s1618_s9 = scalar_lea.hbm %s1924_s30, 16  ;;  %s1622_s12 = scalar_lea.hbm %s1970_s4, 128 }
 0x90e   : > { %p1619_p4 = scmp.ne.s32.totalorder %s1924_s30, %s1618_s9  ;;  %p1623_p9 = scmp.lt.u32.totalorder %s1924_s30, %s1970_s4 }
 0x90f   : > { %p1624_p10 = scmp.lt.u32.totalorder %s1622_s12, %s1618_s9  ;;  %p1626_p12 = scmp.lt.u32.totalorder %s1618_s9, %s1924_s30 }
 0x910   : > { %p1620_p7 = pnand %p1619_p4, %p1738_p5 }
 0x911   : > { %p1625_p11 = por %p1624_p10, %p1623_p9 }
 0x912   : > { %p1621_p8 = pneg %p1620_p7 }
 0x913   : > { %p1627_p13 = por %p1626_p12, %p1625_p11 }
 0x915   : > { %p1628_p0 = pnand %p1627_p13, %p1621_p8 }
 0x917   : > { %1631 = shalt.err (!%p1628_p0)
}
 0x918   : > { %1497 = dma.vmem_to_hbm [thread:$0]  (%p1738_p5), %s1926_s27, 16, %s1924_s30, %s1187_s5  }
 0x919 PF: > { %p1503_p1 = scmp.ge.s32.totalorder %s1666_s18, 2  ;;  %s1211_s20 = sand.u32 1, %s1654_s15  }
 0x91a   : > { %s1212_s22 = scalar_lea.sflag [#allocation3], %s1211_s20 }
 0x91b   : > { %p1500_p2 = pnand %p1503_p1, %p1742_p6 }
 0x91d   : > { %1649 = dma.done.wait (!%p1500_p2), %s1212_s22, 16  }
 0x91e   : > { %1651 = vsyncadd (!%p1500_p2), %s1212_s22, 4294967280  ;;  %p14_p3 = scmp.ge.s32.totalorder %s1725_s21, 10   ;;  %s1973_s15 = smov %s1658_s16 }
 0x91f   : > { %s1974_s16 = smov %s1662_s17  ;;  %s1975_s17 = smov %s1736_s24 }
 0x920   : > { %s1976_s18 = smov %s1725_s21  ;;  %16 = sbr.rel (!%p14_p3) target bundleno = 3 (0x3), region = 74 }
 0x927   :  { %1216 = vsyncpa [#allocation3], 1 }
 0x928   :  { %1218 = vsyncpa [#allocation3 + $0x1], 1 }

</bundles_post_ra>
